<compile_context>
chip_gen: v6e
topology: v6e:2x2x1
jax: 0.10.0
libtpu: 0.0.40
codegen_flags: <defaults>
</compile_context>

<pallas_src>
import jax
import jax.numpy as jnp
from jax.experimental import pallas as pl
from jax.experimental.pallas import tpu as pltpu

K = 784          # 1 * 28 * 28
N = 10
K_PAD = 896      # 7 * 128, lane-aligned contraction dim
N_PAD = 128      # lane-dense output width
TILE_B_MAX = 512 # keeps double-buffered tiles well under v7x VMEM


def _round_up(x, m):
    return (x + m - 1) // m * m


def linear_kernel(x_ref, w_ref, b_ref, o_ref):
    # MXU matmul with f32 accumulation, f32 bias add on the VPU.
    acc = jnp.dot(x_ref[...], w_ref[...], preferred_element_type=jnp.float32)
    o_ref[...] = (acc + b_ref[...]).astype(o_ref.dtype)


def mnist_lr_forward(x, w_t, b):
    """x: (B, C, 28, 28) float32; w_t: (784, 10); b: (10,). Returns (B, 10) f32."""
    B = x.shape[0]
    x_flat = x.reshape(B, K)  # == torch .view(-1, 784)

    # Batch tile: multiple of 8 (sublane), 256-aligned-friendly cap of 512.
    if B <= TILE_B_MAX:
        tile_b = _round_up(max(B, 1), 8)
    else:
        tile_b = TILE_B_MAX
    B_pad = _round_up(B, tile_b)

    # Zero-pad + cast: bf16 activation/weight stream, f32 bias.
    x_p = jnp.zeros((B_pad, K_PAD), jnp.bfloat16).at[:B, :K].set(
        x_flat.astype(jnp.bfloat16))
    w_p = jnp.zeros((K_PAD, N_PAD), jnp.bfloat16).at[:K, :N].set(
        w_t.astype(jnp.bfloat16))
    b_p = jnp.zeros((1, N_PAD), jnp.float32).at[0, :N].set(
        b.astype(jnp.float32))

    grid = (B_pad // tile_b,)

    out_padded = pl.pallas_call(
        linear_kernel,
        out_shape=jax.ShapeDtypeStruct((B_pad, N_PAD), jnp.float32),
        grid_spec=pltpu.PrefetchScalarGridSpec(
            num_scalar_prefetch=0,
            grid=grid,
            in_specs=[
                pl.BlockSpec((tile_b, K_PAD), lambda i: (i, 0)),   # streamed
                pl.BlockSpec((K_PAD, N_PAD), lambda i: (0, 0)),    # resident
                pl.BlockSpec((1, N_PAD), lambda i: (0, 0)),        # resident
            ],
            out_specs=pl.BlockSpec((tile_b, N_PAD), lambda i: (i, 0)),
        ),
        compiler_params=pltpu.CompilerParams(
            dimension_semantics=("parallel",),        # megacore on v7x
            vmem_limit_bytes=32 * 1024 * 1024,
        ),
        cost_estimate=pl.CostEstimate(
            flops=2 * B_pad * K_PAD * N_PAD,
            transcendentals=0,
            bytes_accessed=(2 * (B_pad * K_PAD + K_PAD * N_PAD)    # bf16 in
                            + 4 * (N_PAD + B_pad * N_PAD)),        # f32 bias+out
        ),
    )(x_p, w_p, b_p)

    return out_padded[:B, :N]


def init_params(key, input_dim=1, output_dim=10):
    """Deterministic nn.Linear-style init: U(-1/sqrt(fan_in), 1/sqrt(fan_in))."""
    fan_in = input_dim * 28 * 28
    k_w, k_b = jax.random.split(key)
    bound = 1.0 / jnp.sqrt(fan_in)
    # PyTorch stores weight as (out, in); we keep the transposed (in, out) copy.
    w = jax.random.uniform(k_w, (output_dim, fan_in), jnp.float32, -bound, bound)
    b = jax.random.uniform(k_b, (output_dim,), jnp.float32, -bound, bound)
    return w.T, b


if __name__ == "__main__":
    key = jax.random.PRNGKey(0)
    k_x, k_p = jax.random.split(key)

    B, C = 2, 1
    x = jax.random.normal(k_x, (B, C, 28, 28), jnp.float32)
    w_t, b = init_params(k_p, input_dim=C, output_dim=10)

    out = mnist_lr_forward(x, w_t, b)
    out = jax.block_until_ready(out)
    assert out.shape == (B, 10)

    # Reference with matched bf16 inputs / f32 accumulation (same numerics).
    x_flat = x.reshape(B, 784)
    ref_bf16 = jnp.dot(x_flat.astype(jnp.bfloat16), w_t.astype(jnp.bfloat16),
                       preferred_element_type=jnp.float32) + b
    assert jnp.allclose(out, ref_bf16, atol=1e-4, rtol=1e-4)

    # Loose check against the full-f32 reference (bf16 rounding of inputs).
    ref_f32 = x_flat @ w_t + b
    assert jnp.allclose(out, ref_f32, atol=3e-2, rtol=3e-2)

    print("KERNEL_OK")
</pallas_src>

<mosaic_0001>
module attributes {stable_mosaic.version = 11 : i64} {
  func.func @linear_kernel(%arg0: i32, %arg1: memref<8x896xbf16, #tpu.memory_space<vmem>>, %arg2: memref<896x128xbf16, #tpu.memory_space<vmem>>, %arg3: memref<1x128xf32, #tpu.memory_space<vmem>>, %arg4: memref<8x128xf32, #tpu.memory_space<vmem>>) attributes {dimension_semantics = [#tpu.dimension_semantics<parallel>], iteration_bounds = array<i64: 1>, scalar_prefetch = 0 : i64, scratch_operands = 0 : i64, tpu.core_type = #tpu.core_type<tc>, window_params = [{transform_indices = @transform_0, window_bounds = array<i64: 8, 896>}, {pipeline_mode = #tpu.pipeline_mode<synchronous>, transform_indices = @transform_1, window_bounds = array<i64: 896, 128>}, {pipeline_mode = #tpu.pipeline_mode<synchronous>, transform_indices = @transform_2, window_bounds = array<i64: 1, 128>}, {transform_indices = @transform_3, window_bounds = array<i64: 8, 128>}]} {
    %c0 = arith.constant 0 : index
    %c0_0 = arith.constant 0 : index
    %0 = vector.load %arg1[%c0, %c0_0] : memref<8x896xbf16, #tpu.memory_space<vmem>>, vector<8x896xbf16>
    %c0_1 = arith.constant 0 : index
    %c0_2 = arith.constant 0 : index
    %1 = vector.load %arg2[%c0_1, %c0_2] : memref<896x128xbf16, #tpu.memory_space<vmem>>, vector<896x128xbf16>
    %cst = arith.constant dense<0.000000e+00> : vector<8x128xf32>
    %2 = tpu.matmul %0, %1, %cst {dimension_numbers = #tpu.dot_dimension_numbers<[1], [0], [0], [1], [0, 0, 1, 1], [], []>} : vector<8x896xbf16>, vector<896x128xbf16>, vector<8x128xf32> -> vector<8x128xf32>
    %c0_3 = arith.constant 0 : index
    %c0_4 = arith.constant 0 : index
    %3 = vector.load %arg3[%c0_3, %c0_4] : memref<1x128xf32, #tpu.memory_space<vmem>>, vector<1x128xf32>
    %4 = vector.broadcast %3 : vector<1x128xf32> to vector<8x128xf32>
    %5 = arith.addf %2, %4 : vector<8x128xf32>
    %c0_5 = arith.constant 0 : index
    %c0_6 = arith.constant 0 : index
    %6 = vector.load %arg4[%c0_5, %c0_6] : memref<8x128xf32, #tpu.memory_space<vmem>>, vector<8x128xf32>
    tpu.vector_store %arg4[%c0_5, %c0_6], %5 {strides = array<i32>} : memref<8x128xf32, #tpu.memory_space<vmem>>, vector<8x128xf32>,
    return
  }
  func.func @transform_0(%arg0: i32) -> (i32, i32) {
    %c0_i32 = arith.constant 0 : i32
    %c0_i32_0 = arith.constant 0 : i32
    return %arg0, %c0_i32 : i32, i32
  }
  func.func @transform_1(%arg0: i32) -> (i32, i32) {
    %c0_i32 = arith.constant 0 : i32
    %c0_i32_0 = arith.constant 0 : i32
    %c0_i32_1 = arith.constant 0 : i32
    return %c0_i32, %c0_i32_0 : i32, i32
  }
  func.func @transform_2(%arg0: i32) -> (i32, i32) {
    %c0_i32 = arith.constant 0 : i32
    %c0_i32_0 = arith.constant 0 : i32
    %c0_i32_1 = arith.constant 0 : i32
    return %c0_i32, %c0_i32_0 : i32, i32
  }
  func.func @transform_3(%arg0: i32) -> (i32, i32) {
    %c0_i32 = arith.constant 0 : i32
    %c0_i32_0 = arith.constant 0 : i32
    return %arg0, %c0_i32 : i32, i32
  }
}

</mosaic_0001>

<bundles_post_ra>
// kernel: tpu_custom_call.1
= control target key start
LH: loop header
LB: loop body
LE: loop exit
PB: predicated region body
PF: predicated region fallthrough
CT: control target
= control target key end

     0   :  { %8 = vsyncpa [#allocation3], 0  ;;  %s1037_s0 = inlined_call_operand.hbm [shape: bf16[8,896], index: 0, kind: input, shape index: {}]   ;;  %s1038_s1 = inlined_call_operand.hbm [shape: bf16[896,128], index: 1, kind: input, shape index: {}]   ;;  %s1039_s2 = inlined_call_operand.vmem [shape: f32[1,128], index: 2, kind: input, shape index: {}]   ;;  %s1040_s3 = inlined_call_operand.hbm [shape: f32[8,128], index: 3, kind: output, shape index: {}]  }
   0x1   :  { %9 = vsyncpa [#allocation6], 0 }
   0x2   :  { %10 = vsyncpa [#allocation4], 0  ;;  %s998_s12 = smov [#allocation2]   ;;  %s999_s14 = smov [#allocation5]  }
   0x3   :  { %s17_s13 = sshll.u32 %s998_s12, 4  ;;  %s26_s15 = sshll.u32 %s999_s14, 4  ;;  %s18_s13 = int_to_ptr.vmem [resolvable:$true] %s17_s13  ;;  %s27_s15 = int_to_ptr.vmem [resolvable:$true] %s26_s15 }
   0x4   :  { %s940_s16 = scalar_lea.vmem %s18_s13, 448  ;;  %p945_p1 = scmp.lt.s32.totalorder %s18_s13, %s18_s13 }
   0x5   :  { %p941_p0 = scmp.ne.s32.totalorder %s18_s13, %s940_s16  ;;  %p946_p2 = scmp.lt.s32.totalorder %s940_s16, %s940_s16 }
   0x7   :  { %p947_p3 = por %p946_p2, %p945_p1 }
   0x9   :  { %p948_p4 = pnand %p947_p3, %p941_p0 }
   0xb   :  { %951 = shalt.err (!%p948_p4)
}
   0xc   :  { %20 = dma.hbm_to_vmem [thread:$0]  %s1037_s0, 448, %s18_s13, [#allocation3]  }
   0xd   :  { %s960_s19 = scalar_lea.vmem %s27_s15, 7168  ;;  %p965_p6 = scmp.lt.s32.totalorder %s27_s15, %s27_s15 }
   0xe   :  { %p961_p5 = scmp.ne.s32.totalorder %s27_s15, %s960_s19  ;;  %p966_p7 = scmp.lt.s32.totalorder %s960_s19, %s960_s19 }
  0x10   :  { %p967_p8 = por %p966_p7, %p965_p6 }
  0x12   :  { %p968_p9 = pnand %p967_p8, %p961_p5 }
  0x14   :  { %971 = shalt.err (!%p968_p9)
}
  0x15   :  { %s1000_s20 = smov 64   ;;  %s1001_s21 = smov 4  }
  0x16   :  { %32 = dma.hbm_to_vmem [thread:$0]  %s1038_s1, 7168, %s27_s15, [#allocation6], %s1000_s20, %s1000_s20, %s1001_s21  }
  0x17   :  { %992 = dma.done.wait [#allocation3], 448  }
  0x18   :  { %993 = vsyncadd [#allocation3], 4294966848 }
  0x19   :  { %994 = dma.done.wait [#allocation6], 7168  }
  0x1a   :  { %995 = vsyncadd [#allocation6], 4294960128  ;;  %v869_v0 = vld [vmem:[#allocation5 + $0x78] sm:$0xff]   ;;  %v873_v4 = vld [vmem:[#allocation5 + $0x70] sm:$0xff]   ;;  %v1002_v39 = vmov 0.0   ;;  %vm1003_vm0 = vmmov 0  }
  0x1b   :  { %v870_v1 = vld [vmem:[#allocation5 + $0xf8] sm:$0xff]   ;;  %767 = vmatprep.subr.bf16.mxu0 %v869_v0  ;;  %v874_v5 = vld [vmem:[#allocation5 + $0xf0] sm:$0xff]   ;;  %v877_v8 = vld [vmem:[#allocation5 + $0x68] sm:$0xff]   ;;  %s1004_s24 = smov [#allocation7]  }
  0x1c   :  { %v871_v2 = vld [vmem:[#allocation5 + $0x38] sm:$0xff]   ;;  %789 = vmatprep.subr.bf16.mxu1 %v870_v1  ;;  %v875_v6 = vld [vmem:[#allocation5 + $0x30] sm:$0xff]   ;;  %v878_v9 = vld [vmem:[#allocation5 + $0xe8] sm:$0xff]   ;;  %s693_s25 = sshll.u32 %s1004_s24, 4  ;;  %s694_s25 = int_to_ptr.vmem [resolvable:$true] %s693_s25 }
  0x1d   :  { %v872_v3 = vld [vmem:[#allocation5 + $0xb8] sm:$0xff]   ;;  %768 = vmatpush3.bf16.msra.mxu0 %v871_v2  ;;  %v876_v7 = vld [vmem:[#allocation5 + $0xb0] sm:$0xff]   ;;  %v879_v10 = vld [vmem:[#allocation5 + $0x28] sm:$0xff]   ;;  %s972_s26 = scalar_lea.vmem %s694_s25, 128  ;;  %p977_p11 = scmp.lt.s32.totalorder %s694_s25, %s694_s25 }
  0x1e   :  { %790 = vmatpush3.bf16.msra.mxu1 %v872_v3  ;;  %769 = vmatprep.subr.bf16.mxu0 %v873_v4  ;;  %v880_v11 = vld [vmem:[#allocation5 + $0xa8] sm:$0xff]   ;;  %v881_v12 = vld [vmem:[#allocation5 + $0x60] sm:$0xff]   ;;  %v885_v16 = vld [vmem:[#allocation5 + $0x58] sm:$0xff]   ;;  %p973_p10 = scmp.ne.s32.totalorder %s694_s25, %s972_s26  ;;  %p978_p12 = scmp.lt.s32.totalorder %s972_s26, %s972_s26 }
  0x1f   :  { %791 = vmatprep.subr.bf16.mxu1 %v874_v5  ;;  %v882_v13 = vld [vmem:[#allocation5 + $0xe0] sm:$0xff]   ;;  %v886_v17 = vld [vmem:[#allocation5 + $0xd8] sm:$0xff]   ;;  %v889_v20 = vld [vmem:[#allocation5 + $0x50] sm:$0xff]  }
  0x20   :  { %v883_v14 = vld [vmem:[#allocation5 + $0x20] sm:$0xff]   ;;  %v887_v18 = vld [vmem:[#allocation5 + $0x18] sm:$0xff]   ;;  %v890_v21 = vld [vmem:[#allocation5 + $0xd0] sm:$0xff]   ;;  %p979_p13 = por %p978_p12, %p977_p11 }
  0x21   :  { %770 = vmatpush3.bf16.msra.mxu0 %v875_v6  ;;  %v884_v15 = vld [vmem:[#allocation5 + $0xa0] sm:$0xff]   ;;  %v888_v19 = vld [vmem:[#allocation5 + $0x98] sm:$0xff]   ;;  %v891_v22 = vld [vmem:[#allocation5 + $0x10] sm:$0xff]  }
  0x22   :  { %792 = vmatpush3.bf16.msra.mxu1 %v876_v7  ;;  %771 = vmatprep.subr.bf16.mxu0 %v877_v8  ;;  %v892_v23 = vld [vmem:[#allocation5 + $0x90] sm:$0xff]   ;;  %v893_v24 = vld [vmem:[#allocation5 + $0x48] sm:$0xff]   ;;  %v897_v28 = vld [vmem:[#allocation5 + $0x40] sm:$0xff]   ;;  %p980_p0 = pnand %p979_p13, %p973_p10 }
  0x23   :  { %793 = vmatprep.subr.bf16.mxu1 %v878_v9  ;;  %v894_v25 = vld [vmem:[#allocation5 + $0xc8] sm:$0xff]   ;;  %v898_v29 = vld [vmem:[#allocation5 + $0xc0] sm:$0xff]   ;;  %v905_v38 = vld [vmem:[#allocation5 + $0x178] sm:$0xff]  }
  0x24   :  { %v895_v26 = vld [vmem:[#allocation5 + $0x8] sm:$0xff]   ;;  %v899_v30 = vld [vmem:[#allocation5] sm:$0xff]   ;;  %v906_v40 = vld [vmem:[#allocation5 + $0x138] sm:$0xff]  }
  0x25   :  { %772 = vmatpush3.bf16.msra.mxu0 %v879_v10  ;;  %v896_v27 = vld [vmem:[#allocation5 + $0x88] sm:$0xff]   ;;  %v900_v31 = vld [vmem:[#allocation5 + $0x80] sm:$0xff]   ;;  %v907_v41 = vld [vmem:[#allocation5 + $0x1b8] sm:$0xff]  }
  0x26   :  { %794 = vmatpush3.bf16.msra.mxu1 %v880_v11  ;;  %773 = vmatprep.subr.bf16.mxu0 %v881_v12  ;;  %v42_v32 = vld [vmem:[#allocation2] sm:$0xff]  ;;  %v43_v33 = vld [vmem:[#allocation2 + $0x8] sm:$0xff]  ;;  %v917_v51 = vld [vmem:[#allocation5 + $0x158] sm:$0xff]  }
  0x27   :  { %795 = vmatprep.subr.bf16.mxu1 %v882_v13  ;;  %v704_v34 = vcombine.low %v42_v32, %v42_v32  ;;  %v705_v35 = vcombine.high %v42_v32, %v42_v32  ;;  %v706_v36 = vcombine.low %v43_v33, %v43_v33  ;;  %v707_v37 = vcombine.high %v43_v33, %v43_v33  ;;  %v908_v42 = vld [vmem:[#allocation5 + $0x170] sm:$0xff]   ;;  %v911_v45 = vld [vmem:[#allocation5 + $0x168] sm:$0xff]   ;;  %v914_v48 = vld [vmem:[#allocation5 + $0x160] sm:$0xff]  }
  0x28   :  { %v909_v43 = vld [vmem:[#allocation5 + $0x130] sm:$0xff]   ;;  %v913_v46 = vld [vmem:[#allocation5 + $0x1a8] sm:$0xff]   ;;  %v916_v49 = vld [vmem:[#allocation5 + $0x1a0] sm:$0xff]  }
  0x29   :  { %774 = vmatpush3.bf16.msra.mxu0 %v883_v14  ;;  %558 = vmatprep.mubr.bf16.mxu0 %v705_v35  ;;  %v910_v44 = vld [vmem:[#allocation5 + $0x1b0] sm:$0xff]   ;;  %v912_v47 = vld [vmem:[#allocation5 + $0x128] sm:$0xff]   ;;  %v915_v50 = vld [vmem:[#allocation5 + $0x120] sm:$0xff]  }
  0x2a   :  { %796 = vmatpush3.bf16.msra.mxu1 %v884_v15  ;;  %775 = vmatprep.subr.bf16.mxu0 %v885_v16  ;;  %v919_v52 = vld [vmem:[#allocation5 + $0x198] sm:$0xff]   ;;  %v920_v54 = vld [vmem:[#allocation5 + $0x150] sm:$0xff]   ;;  %v923_v57 = vld [vmem:[#allocation5 + $0x148] sm:$0xff]  }
  0x2b   :  { %797 = vmatprep.subr.bf16.mxu1 %v886_v17  ;;  %598 = vmatprep.mubr.bf16.mxu1 %v707_v37  ;;  %v918_v53 = vld [vmem:[#allocation5 + $0x118] sm:$0xff]   ;;  %v922_v55 = vld [vmem:[#allocation5 + $0x190] sm:$0xff]   ;;  %v925_v59 = vld [vmem:[#allocation5 + $0x188] sm:$0xff]  }
  0x2c   :  { %v921_v56 = vld [vmem:[#allocation5 + $0x110] sm:$0xff]   ;;  %v924_v61 = vld [vmem:[#allocation5 + $0x108] sm:$0xff]   ;;  %v926_v62 = vld [vmem:[#allocation5 + $0x140] sm:$0xff]  }
  0x2d   :  { %776 = vmatpush3.bf16.msra.mxu0 %v887_v18  ;;  %v44_v58 = vld [vmem:[#allocation2 + $0x10] sm:$0xff]  ;;  %v928_v63 = vld [vmem:[#allocation5 + $0x180] sm:$0xff]   ;;  %v931_v1 = vld [vmem:[#allocation2 + $0x18] ss:$0 sps:$4 sm:$0xff]  }
  0x2e   :  { %798 = vmatpush3.bf16.msra.mxu1 %v888_v19  ;;  %777 = vmatprep.subr.bf16.mxu0 %v889_v20  ;;  %v709_v60 = vcombine.high %v44_v58, %v44_v58  ;;  %v927_v0 = vld [vmem:[#allocation5 + $0x100] sm:$0xff]   ;;  %v708_v2 = vcombine.low %v44_v58, %v44_v58 }
  0x2f   :  { %799 = vmatprep.subr.bf16.mxu1 %v890_v21  ;;  %v703_v12 = vld [vmem:[%s1039_s2] ss:$0 sm:$0xff] }
  0x31   :  { %778 = vmatpush3.bf16.msra.mxu0 %v891_v22 }
  0x32   :  { %800 = vmatpush3.bf16.msra.mxu1 %v892_v23  ;;  %779 = vmatprep.subr.bf16.mxu0 %v893_v24 }
  0x33   :  { %801 = vmatprep.subr.bf16.mxu1 %v894_v25 }
  0x35   :  { %780 = vmatpush3.bf16.msra.mxu0 %v895_v26 }
  0x36   :  { %802 = vmatpush3.bf16.msra.mxu1 %v896_v27  ;;  %781 = vmatprep.subr.bf16.mxu0 %v897_v28 }
  0x37   :  { %803 = vmatprep.subr.bf16.mxu1 %v898_v29 }
  0x39   :  { %782 = vmatpush3.bf16.msra.mxu0 %v899_v30 }
  0x3a   :  { %804 = vmatpush3.bf16.msra.mxu1 %v900_v31  ;;  %811 = vmatprep.subr.bf16.mxu0 %v905_v38 }
  0x3b   :  { %842 = vmatprep.subr.bf16.mxu1 %v1002_v39 }
  0x3c   :  { %559 = vmatmul.mubr.bf16.vlgmr.msra.gmra.mxu0 %v704_v34 }
  0x3d   :  { %599 = vmatmul.mubr.bf16.vlgmr.msra.gmra.mxu1 %v706_v36  ;;  %812 = vmatpush3.bf16.msra.mxu0 %v906_v40 }
  0x3e   :  { %843 = vmatpush3.bf16.msra.mxu1 %v907_v41  ;;  %813 = vmatprep.subr.bf16.mxu0 %v908_v42 }
  0x3f   :  { %844 = vmatprep.subr.bf16.mxu1 %v1002_v39  ;;  %858 = vmatprep.mubr.msk.bf16.mxu1 %vm1003_vm0, %v1002_v39 }
  0x40   :  { %638 = vmatprep.mubr.bf16.mxu0 %v709_v60 }
  0x41   :  { %814 = vmatpush3.bf16.msra.mxu0 %v909_v43 }
  0x42   :  { %845 = vmatpush3.bf16.msra.mxu1 %v910_v44  ;;  %815 = vmatprep.subr.bf16.mxu0 %v911_v45 }
  0x43   :  { %846 = vmatprep.subr.bf16.mxu1 %v1002_v39 }
  0x45   :  { %816 = vmatpush3.bf16.msra.mxu0 %v912_v47 }
  0x46   :  { %847 = vmatpush3.bf16.msra.mxu1 %v913_v46  ;;  %817 = vmatprep.subr.bf16.mxu0 %v914_v48 }
  0x47   :  { %848 = vmatprep.subr.bf16.mxu1 %v1002_v39 }
  0x49   :  { %818 = vmatpush3.bf16.msra.mxu0 %v915_v50 }
  0x4a   :  { %849 = vmatpush3.bf16.msra.mxu1 %v916_v49  ;;  %819 = vmatprep.subr.bf16.mxu0 %v917_v51 }
  0x4b   :  { %850 = vmatprep.subr.bf16.mxu1 %v1002_v39 }
  0x4d   :  { %820 = vmatpush3.bf16.msra.mxu0 %v918_v53 }
  0x4e   :  { %851 = vmatpush3.bf16.msra.mxu1 %v919_v52  ;;  %821 = vmatprep.subr.bf16.mxu0 %v920_v54 }
  0x4f   :  { %852 = vmatprep.subr.bf16.mxu1 %v1002_v39 }
  0x51   :  { %822 = vmatpush3.bf16.msra.mxu0 %v921_v56 }
  0x52   :  { %853 = vmatpush3.bf16.msra.mxu1 %v922_v55  ;;  %823 = vmatprep.subr.bf16.mxu0 %v923_v57 }
  0x53   :  { %854 = vmatprep.subr.bf16.mxu1 %v1002_v39 }
  0x55   :  { %824 = vmatpush3.bf16.msra.mxu0 %v924_v61 }
  0x56   :  { %855 = vmatpush3.bf16.msra.mxu1 %v925_v59  ;;  %825 = vmatprep.subr.bf16.mxu0 %v926_v62 }
  0x57   :  { %856 = vmatprep.subr.bf16.mxu1 %v1002_v39 }
  0x59   :  { %826 = vmatpush3.bf16.msra.mxu0 %v927_v0 }
  0x5a   :  { %857 = vmatpush3.bf16.msra.mxu1 %v928_v63 }
  0x5c   :  { %639 = vmatmul.mubr.bf16.vlgmr.msra.gmra.mxu0 %v708_v2 }
  0x5d   :  { %859 = vmatmul.mubr.bf16.vlgmr.msra.gmra.mxu1 %v931_v1 }
  0xfc   :  { %v783_v3 = vpop.f32.mrf.mxu0 }
  0xfd   :  { %v805_v4 = vpop.f32.mrf.mxu1 }
  0xfe   :  { %v784_v5 = vpop.f32.mrf.mxu0 }
  0xff   :  { %v806_v6 = vpop.f32.mrf.mxu1  ;;  %v785_v11 = vadd.f32 %v784_v5, %v783_v3 }
 0x100   :  { %v786_v7 = vpop.f32.mrf.mxu0  ;;  %v807_v14 = vadd.f32 %v806_v6, %v805_v4 }
 0x101   :  { %v808_v8 = vpop.f32.mrf.mxu1  ;;  %v561_v13 = vadd.f32 %v785_v11, %v703_v12 }
 0x102   :  { %v787_v9 = vpop.f32.mrf.mxu0 }
 0x103   :  { %v809_v10 = vpop.f32.mrf.mxu1  ;;  %v601_v19 = vadd.f32 %v807_v14, %v561_v13 }
 0x11c   :  { %v827_v16 = vpop.f32.mrf.mxu0 }
 0x11d   :  { %v680_v15 = vpop.f32.mrf.mxu1 }
 0x11e   :  { %v828_v18 = vpop.f32.mrf.mxu0 }
 0x11f   :  { %v860_v17 = vpop.f32.mrf.mxu1  ;;  %v829_v20 = vadd.f32 %v828_v18, %v827_v16 }
 0x120   :  { %v830_v22 = vpop.f32.mrf.mxu0 }
 0x121   :  { %v683_v21 = vpop.f32.mrf.mxu1  ;;  %v641_v23 = vadd.f32 %v829_v20, %v601_v19 }
 0x122   :  { %v831_v25 = vpop.f32.mrf.mxu0 }
 0x123   :  { %v861_v24 = vpop.f32.mrf.mxu1  ;;  %v681_v26 = vadd.f32 %v680_v15, %v641_v23 }
 0x125   :  { %686 = vst [vmem:[#allocation7] sm:$0xff] %v681_v26 }
 0x126   :  { %983 = shalt.err (!%p980_p0)
}
 0x127   :  { %696 = dma.vmem_to_hbm [thread:$0]  %s694_s25, 128, %s1040_s3, [#allocation4]  }
 0x128   :  { %996 = dma.done.wait [#allocation4], 128  }
 0x129   :  { %997 = vsyncadd [#allocation4], 4294967168 }
 0x12a   :  { %700 = vsyncpa [#allocation3], 1 }
 0x12b   :  { %701 = vsyncpa [#allocation6], 1 }
 0x12c   :  { %702 = vsyncpa [#allocation4], 1 }

</bundles_post_ra>
